<compile_context>
chip_gen: v5e
topology: v5e:2x2
jax: 0.10.0
libtpu: 0.0.40
codegen_flags: <defaults>
</compile_context>

<pallas_src>
import jax
import jax.numpy as jnp
from jax.experimental import pallas as pl
from jax.experimental.pallas import tpu as pltpu


def basic_block_kernel(x_ref,
                       s1_ref, t1_ref,
                       w1_ref, b1_ref,
                       w2_ref, b2_ref,
                       w3_ref, b3_ref,
                       o_ref):
    """One (Cin, tile_hw) channel-major tile.

    x_ref : (Cin,  tile_hw)  activations in upstream dtype (f32), cast in-kernel
    s1/t1 : (Cin, 1)         folded BatchNorm1 scale / shift (elementwise dtype)
    w1/b1 : conv1 with BN2 folded in (weights in MXU dtype, bias f32)
    w2/b2 : conv2 with BN3 folded in
    w3/b3 : conv3
    o_ref : (Cout, tile_hw)  bf16 output (f32 accumulation inside)
    """
    # BN1 + ReLU in the chip-appropriate elementwise dtype (bf16 on v6e/v7x, f32 on v5e).
    x = x_ref[...].astype(s1_ref.dtype)
    h = jnp.maximum(x * s1_ref[...] + t1_ref[...], 0.0)

    # conv1 (+ folded BN2) -> ReLU
    h = jnp.dot(w1_ref[...], h.astype(w1_ref.dtype),
                preferred_element_type=jnp.float32)
    h = jnp.maximum(h + b1_ref[...], 0.0)

    # conv2 (k=1 per the reference) (+ folded BN3) -> ReLU
    h = jnp.dot(w2_ref[...], h.astype(w2_ref.dtype),
                preferred_element_type=jnp.float32)
    h = jnp.maximum(h + b2_ref[...], 0.0)

    # conv3
    h = jnp.dot(w3_ref[...], h.astype(w3_ref.dtype),
                preferred_element_type=jnp.float32) + b3_ref[...]

    o_ref[...] = h.astype(o_ref.dtype)


def fold_bn(gamma, beta, mean, var, eps=1e-5):
    scale = gamma.astype(jnp.float32) / jnp.sqrt(var.astype(jnp.float32) + eps)
    shift = beta.astype(jnp.float32) - mean.astype(jnp.float32) * scale
    return scale[:, None], shift[:, None]          # (C, 1) f32


def _vmem_capacity_bytes():
    try:
        return int(pltpu.get_tpu_info().vmem_capacity_bytes)
    except Exception:
        return 64 * 1024 * 1024      # v7x per-TC capacity: safe lower bound


def _elementwise_dtype():
    """bf16 VPU path on v6e/v7x; f32 on v5e (no bf16 VALU/EUP)."""
    try:
        kind = jax.devices()[0].device_kind.lower()
    except Exception:
        return jnp.float32
    return jnp.bfloat16 if ("v6" in kind or "v7" in kind) else jnp.float32


def _pick_tile_hw(hw_pad, cin, cb, cout, x_bytes, out_bytes, vmem_budget):
    """Largest lane-aligned tile fitting the VMEM budget (double-buffered I/O blocks
    plus f32 temporaries), capped at the padded spatial extent."""
    per_col = (2 * (cin * x_bytes + cout * out_bytes)      # pipelined in/out blocks
               + 4 * (cin + 2 * cb + cout))                 # in-kernel f32 temporaries
    tile = (vmem_budget // per_col) // 128 * 128
    return int(max(128, min(tile, hw_pad)))


def basic_block_forward(x_nchw, params, *, mxu_dtype=jnp.bfloat16):
    """x_nchw: (N, Cin, H, W).  Returns (N, planes, H, W) in bf16."""
    N, Cin, H, W = x_nchw.shape
    Cb = params["w1"].shape[0]       # bottleneck planes = planes // 4
    Cout = params["w3"].shape[0]     # planes
    hw = H * W
    out_dtype = jnp.bfloat16
    elem_dtype = _elementwise_dtype()

    # Channel-major (N, C, H*W): contiguous view of NCHW -> no transpose, no astype.
    x = x_nchw.reshape(N, Cin, hw)
    hw_pad = pl.cdiv(hw, 128) * 128
    if hw_pad != hw:
        # Rare path; padded columns never feed spatial reductions and are sliced off.
        x = jnp.pad(x, ((0, 0), (0, 0), (0, hw_pad - hw)))

    # Fold BatchNorms (eval mode) in f32.  BN2/BN3 fold *exactly* into conv1/conv2
    # (no nonlinearity between a conv output and the following BN).
    s1, t1 = fold_bn(params["g1"], params["be1"], params["m1"], params["v1"])
    s2, t2 = fold_bn(params["g2"], params["be2"], params["m2"], params["v2"])
    s3, t3 = fold_bn(params["g3"], params["be3"], params["m3"], params["v3"])

    w1 = (params["w1"].astype(jnp.float32) * s2).astype(mxu_dtype)          # (Cb, Cin)
    b1 = params["b1"].astype(jnp.float32)[:, None] * s2 + t2                # (Cb, 1) f32
    w2 = (params["w2"].astype(jnp.float32) * s3).astype(mxu_dtype)          # (Cb, Cb)
    b2 = params["b2"].astype(jnp.float32)[:, None] * s3 + t3                # (Cb, 1) f32
    w3 = params["w3"].astype(mxu_dtype)                                     # (Cout, Cb)
    b3 = params["b3"].astype(jnp.float32)[:, None]                          # (Cout, 1)
    s1 = s1.astype(elem_dtype)
    t1 = t1.astype(elem_dtype)

    # Tile sizing from a per-generation VMEM budget (v7x = 64 MiB, v5e/v6e = 128 MiB),
    # with an explicit scoped-VMEM limit (v5e default is only 16 MiB).
    vmem_cap = _vmem_capacity_bytes()
    tile_hw = _pick_tile_hw(hw_pad, Cin, Cb, Cout,
                            x_bytes=x.dtype.itemsize,
                            out_bytes=jnp.dtype(out_dtype).itemsize,
                            vmem_budget=vmem_cap // 4)
    grid = (N, pl.cdiv(hw_pad, tile_hw))
    vmem_limit = int(min(vmem_cap * 3 // 4, 96 * 1024 * 1024))

    # Grid-invariant operands: full-array blocks pinned to block (0, 0); Pallas does not
    # re-DMA a block whose index is unchanged between consecutive grid steps.
    const = lambda shape: pl.BlockSpec(shape, lambda n, j: (0, 0))

    out = pl.pallas_call(
        basic_block_kernel,
        out_shape=jax.ShapeDtypeStruct((N, Cout, hw_pad), out_dtype),
        grid_spec=pltpu.PrefetchScalarGridSpec(
            num_scalar_prefetch=0,
            grid=grid,
            in_specs=[
                pl.BlockSpec((None, Cin, tile_hw), lambda n, j: (n, 0, j)),   # x
                const((Cin, 1)), const((Cin, 1)),                 # s1, t1
                const((Cb, Cin)), const((Cb, 1)),                 # w1(+BN2), b1(+BN2)
                const((Cb, Cb)), const((Cb, 1)),                  # w2(+BN3), b2(+BN3)
                const((Cout, Cb)), const((Cout, 1)),              # w3, b3
            ],
            out_specs=pl.BlockSpec((None, Cout, tile_hw), lambda n, j: (n, 0, j)),
        ),
        compiler_params=pltpu.CompilerParams(
            dimension_semantics=("parallel", "parallel"),
            vmem_limit_bytes=vmem_limit),
    )(x, s1, t1, w1, b1, w2, b2, w3, b3)

    if hw_pad != hw:
        out = out[:, :, :hw]
    # (N, Cout, hw) -> (N, Cout, H, W): contiguous reshape, no transpose.
    return out.reshape(N, Cout, H, W)


def make_params(key, inplanes, planes):
    bottleneck = planes // 4
    ks = jax.random.split(key, 10)
    p = {}
    # conv weights stored in PyTorch (out, in) layout (kernel_size=1 squeezed).
    p["w1"] = jax.random.normal(ks[0], (bottleneck, inplanes), jnp.float32) * 0.1
    p["b1"] = jax.random.normal(ks[1], (bottleneck,), jnp.float32) * 0.1
    p["w2"] = jax.random.normal(ks[2], (bottleneck, bottleneck), jnp.float32) * 0.1
    p["b2"] = jax.random.normal(ks[3], (bottleneck,), jnp.float32) * 0.1
    p["w3"] = jax.random.normal(ks[4], (planes, bottleneck), jnp.float32) * 0.1
    p["b3"] = jax.random.normal(ks[5], (planes,), jnp.float32) * 0.1
    # BatchNorm (eval-mode) affine params / running stats.
    p["g1"] = 1.0 + 0.1 * jax.random.normal(ks[6], (inplanes,), jnp.float32)
    p["be1"] = 0.1 * jax.random.normal(ks[7], (inplanes,), jnp.float32)
    p["m1"] = 0.1 * jax.random.normal(ks[8], (inplanes,), jnp.float32)
    p["v1"] = jnp.abs(1.0 + 0.1 * jax.random.normal(ks[9], (inplanes,), jnp.float32))
    p["g2"] = 1.0 + 0.05 * jnp.arange(bottleneck, dtype=jnp.float32)
    p["be2"] = 0.02 * jnp.arange(bottleneck, dtype=jnp.float32)
    p["m2"] = 0.01 * jnp.arange(bottleneck, dtype=jnp.float32)
    p["v2"] = jnp.ones((bottleneck,), jnp.float32) * 1.1
    p["g3"] = 1.0 - 0.03 * jnp.arange(bottleneck, dtype=jnp.float32)
    p["be3"] = -0.01 * jnp.arange(bottleneck, dtype=jnp.float32)
    p["m3"] = 0.02 * jnp.arange(bottleneck, dtype=jnp.float32)
    p["v3"] = jnp.ones((bottleneck,), jnp.float32) * 0.9
    return p


def reference_forward(x_nchw, params):
    """Pure-JAX f32 reference: direct translation of the PyTorch forward (eval-mode BN).
    Also validates that the wrapper's BN2/BN3-into-conv folding is exact."""
    def bn(x, g, b, m, v, eps=1e-5):
        s = g / jnp.sqrt(v + eps)
        t = b - m * s
        return x * s.reshape(1, -1, 1, 1) + t.reshape(1, -1, 1, 1)

    def conv1x1(h, w, b):   # w: (Cout, Cin)
        return jnp.einsum("nchw,dc->ndhw", h, w) + b.reshape(1, -1, 1, 1)

    h = x_nchw.astype(jnp.float32)
    h = conv1x1(jnp.maximum(bn(h, params["g1"], params["be1"], params["m1"], params["v1"]), 0.0),
                params["w1"], params["b1"])
    h = conv1x1(jnp.maximum(bn(h, params["g2"], params["be2"], params["m2"], params["v2"]), 0.0),
                params["w2"], params["b2"])
    h = conv1x1(jnp.maximum(bn(h, params["g3"], params["be3"], params["m3"], params["v3"]), 0.0),
                params["w3"], params["b3"])
    return h


if __name__ == "__main__":
    key = jax.random.PRNGKey(0)
    kx, kp = jax.random.split(key)

    N, inplanes, H, W = 2, 16, 16, 16
    planes = 32                       # bottleneck_planes = planes // 4 = 8
    x = jax.random.normal(kx, (N, inplanes, H, W), jnp.float32)
    params = make_params(kp, inplanes, planes)

    out = jax.block_until_ready(basic_block_forward(x, params))
    assert out.shape == (N, planes, H, W)

    ref = reference_forward(x, params)
    out_f32 = out.astype(jnp.float32)
    max_err = jnp.max(jnp.abs(out_f32 - ref))
    # bf16 MXU inputs + bf16 output (+ bf16 BN on v6e/v7x) vs f32 reference.
    assert jnp.allclose(out_f32, ref, atol=5e-2, rtol=5e-2), f"max err {max_err}"

    print("KERNEL_OK")
</pallas_src>

<mosaic_0001>
module attributes {stable_mosaic.version = 11 : i64} {
  func.func @basic_block_kernel(%arg0: i32, %arg1: i32, %arg2: memref<1x16x256xf32, #tpu.memory_space<vmem>>, %arg3: memref<16x1xf32, #tpu.memory_space<vmem>>, %arg4: memref<16x1xf32, #tpu.memory_space<vmem>>, %arg5: memref<8x16xbf16, #tpu.memory_space<vmem>>, %arg6: memref<8x1xf32, #tpu.memory_space<vmem>>, %arg7: memref<8x8xbf16, #tpu.memory_space<vmem>>, %arg8: memref<8x1xf32, #tpu.memory_space<vmem>>, %arg9: memref<32x8xbf16, #tpu.memory_space<vmem>>, %arg10: memref<32x1xf32, #tpu.memory_space<vmem>>, %arg11: memref<1x32x256xbf16, #tpu.memory_space<vmem>>) attributes {dimension_semantics = [#tpu.dimension_semantics<parallel>, #tpu.dimension_semantics<parallel>], iteration_bounds = array<i64: 2, 1>, scalar_prefetch = 0 : i64, scratch_operands = 0 : i64, tpu.core_type = #tpu.core_type<tc>, window_params = [{transform_indices = @transform_0, window_bounds = array<i64: 1, 16, 256>}, {pipeline_mode = #tpu.pipeline_mode<synchronous>, transform_indices = @transform_1, window_bounds = array<i64: 16, 1>}, {pipeline_mode = #tpu.pipeline_mode<synchronous>, transform_indices = @transform_2, window_bounds = array<i64: 16, 1>}, {pipeline_mode = #tpu.pipeline_mode<synchronous>, transform_indices = @transform_3, window_bounds = array<i64: 8, 16>}, {pipeline_mode = #tpu.pipeline_mode<synchronous>, transform_indices = @transform_4, window_bounds = array<i64: 8, 1>}, {pipeline_mode = #tpu.pipeline_mode<synchronous>, transform_indices = @transform_5, window_bounds = array<i64: 8, 8>}, {pipeline_mode = #tpu.pipeline_mode<synchronous>, transform_indices = @transform_6, window_bounds = array<i64: 8, 1>}, {pipeline_mode = #tpu.pipeline_mode<synchronous>, transform_indices = @transform_7, window_bounds = array<i64: 32, 8>}, {pipeline_mode = #tpu.pipeline_mode<synchronous>, transform_indices = @transform_8, window_bounds = array<i64: 32, 1>}, {transform_indices = @transform_9, window_bounds = array<i64: 1, 32, 256>}]} {
    %c0 = arith.constant 0 : index
    %c0_0 = arith.constant 0 : index
    %c0_1 = arith.constant 0 : index
    %0 = vector.load %arg2[%c0, %c0_0, %c0_1] : memref<1x16x256xf32, #tpu.memory_space<vmem>>, vector<1x16x256xf32>
    %1 = vector.shape_cast %0 : vector<1x16x256xf32> to vector<16x256xf32>
    %c0_2 = arith.constant 0 : index
    %c0_3 = arith.constant 0 : index
    %2 = vector.load %arg3[%c0_2, %c0_3] : memref<16x1xf32, #tpu.memory_space<vmem>>, vector<16x1xf32>
    %3 = vector.broadcast %2 : vector<16x1xf32> to vector<16x256xf32>
    %4 = arith.mulf %1, %3 : vector<16x256xf32>
    %c0_4 = arith.constant 0 : index
    %c0_5 = arith.constant 0 : index
    %5 = vector.load %arg4[%c0_4, %c0_5] : memref<16x1xf32, #tpu.memory_space<vmem>>, vector<16x1xf32>
    %6 = vector.broadcast %5 : vector<16x1xf32> to vector<16x256xf32>
    %7 = arith.addf %4, %6 : vector<16x256xf32>
    %cst = arith.constant 0.000000e+00 : f32
    %8 = vector.broadcast %cst : f32 to vector<16x256xf32>
    %9 = arith.maximumf %7, %8 : vector<16x256xf32>
    %c0_6 = arith.constant 0 : index
    %c0_7 = arith.constant 0 : index
    %10 = vector.load %arg5[%c0_6, %c0_7] : memref<8x16xbf16, #tpu.memory_space<vmem>>, vector<8x16xbf16>
    %11 = arith.truncf %9 : vector<16x256xf32> to vector<16x256xbf16>
    %cst_8 = arith.constant dense<0.000000e+00> : vector<8x256xf32>
    %12 = tpu.matmul %10, %11, %cst_8 {dimension_numbers = #tpu.dot_dimension_numbers<[1], [0], [0], [1], [0, 0, 1, 1], [], []>} : vector<8x16xbf16>, vector<16x256xbf16>, vector<8x256xf32> -> vector<8x256xf32>
    %c0_9 = arith.constant 0 : index
    %c0_10 = arith.constant 0 : index
    %13 = vector.load %arg6[%c0_9, %c0_10] : memref<8x1xf32, #tpu.memory_space<vmem>>, vector<8x1xf32>
    %14 = vector.broadcast %13 : vector<8x1xf32> to vector<8x256xf32>
    %15 = arith.addf %12, %14 : vector<8x256xf32>
    %cst_11 = arith.constant 0.000000e+00 : f32
    %16 = vector.broadcast %cst_11 : f32 to vector<8x256xf32>
    %17 = arith.maximumf %15, %16 : vector<8x256xf32>
    %c0_12 = arith.constant 0 : index
    %c0_13 = arith.constant 0 : index
    %18 = vector.load %arg7[%c0_12, %c0_13] : memref<8x8xbf16, #tpu.memory_space<vmem>>, vector<8x8xbf16>
    %19 = arith.truncf %17 : vector<8x256xf32> to vector<8x256xbf16>
    %cst_14 = arith.constant dense<0.000000e+00> : vector<8x256xf32>
    %20 = tpu.matmul %18, %19, %cst_14 {dimension_numbers = #tpu.dot_dimension_numbers<[1], [0], [0], [1], [0, 0, 1, 1], [], []>} : vector<8x8xbf16>, vector<8x256xbf16>, vector<8x256xf32> -> vector<8x256xf32>
    %c0_15 = arith.constant 0 : index
    %c0_16 = arith.constant 0 : index
    %21 = vector.load %arg8[%c0_15, %c0_16] : memref<8x1xf32, #tpu.memory_space<vmem>>, vector<8x1xf32>
    %22 = vector.broadcast %21 : vector<8x1xf32> to vector<8x256xf32>
    %23 = arith.addf %20, %22 : vector<8x256xf32>
    %cst_17 = arith.constant 0.000000e+00 : f32
    %24 = vector.broadcast %cst_17 : f32 to vector<8x256xf32>
    %25 = arith.maximumf %23, %24 : vector<8x256xf32>
    %c0_18 = arith.constant 0 : index
    %c0_19 = arith.constant 0 : index
    %26 = vector.load %arg9[%c0_18, %c0_19] : memref<32x8xbf16, #tpu.memory_space<vmem>>, vector<32x8xbf16>
    %27 = arith.truncf %25 : vector<8x256xf32> to vector<8x256xbf16>
    %cst_20 = arith.constant dense<0.000000e+00> : vector<32x256xf32>
    %28 = tpu.matmul %26, %27, %cst_20 {dimension_numbers = #tpu.dot_dimension_numbers<[1], [0], [0], [1], [0, 0, 1, 1], [], []>} : vector<32x8xbf16>, vector<8x256xbf16>, vector<32x256xf32> -> vector<32x256xf32>
    %c0_21 = arith.constant 0 : index
    %c0_22 = arith.constant 0 : index
    %29 = vector.load %arg10[%c0_21, %c0_22] : memref<32x1xf32, #tpu.memory_space<vmem>>, vector<32x1xf32>
    %30 = vector.broadcast %29 : vector<32x1xf32> to vector<32x256xf32>
    %31 = arith.addf %28, %30 : vector<32x256xf32>
    %32 = arith.truncf %31 : vector<32x256xf32> to vector<32x256xbf16>
    %c0_23 = arith.constant 0 : index
    %c0_24 = arith.constant 0 : index
    %c0_25 = arith.constant 0 : index
    %33 = vector.load %arg11[%c0_23, %c0_24, %c0_25] : memref<1x32x256xbf16, #tpu.memory_space<vmem>>, vector<1x32x256xbf16>
    %34 = vector.shape_cast %33 : vector<1x32x256xbf16> to vector<32x256xbf16>
    %35 = vector.shape_cast %32 : vector<32x256xbf16> to vector<1x32x256xbf16>
    tpu.vector_store %arg11[%c0_23, %c0_24, %c0_25], %35 {strides = array<i32>} : memref<1x32x256xbf16, #tpu.memory_space<vmem>>, vector<1x32x256xbf16>,
    return
  }
  func.func @transform_0(%arg0: i32, %arg1: i32) -> (i32, i32, i32) {
    %c0_i32 = arith.constant 0 : i32
    %c0_i32_0 = arith.constant 0 : i32
    return %arg0, %c0_i32, %arg1 : i32, i32, i32
  }
  func.func @transform_1(%arg0: i32, %arg1: i32) -> (i32, i32) {
    %c0_i32 = arith.constant 0 : i32
    %c0_i32_0 = arith.constant 0 : i32
    %c0_i32_1 = arith.constant 0 : i32
    return %c0_i32, %c0_i32_0 : i32, i32
  }
  func.func @transform_2(%arg0: i32, %arg1: i32) -> (i32, i32) {
    %c0_i32 = arith.constant 0 : i32
    %c0_i32_0 = arith.constant 0 : i32
    %c0_i32_1 = arith.constant 0 : i32
    return %c0_i32, %c0_i32_0 : i32, i32
  }
  func.func @transform_3(%arg0: i32, %arg1: i32) -> (i32, i32) {
    %c0_i32 = arith.constant 0 : i32
    %c0_i32_0 = arith.constant 0 : i32
    %c0_i32_1 = arith.constant 0 : i32
    return %c0_i32, %c0_i32_0 : i32, i32
  }
  func.func @transform_4(%arg0: i32, %arg1: i32) -> (i32, i32) {
    %c0_i32 = arith.constant 0 : i32
    %c0_i32_0 = arith.constant 0 : i32
    %c0_i32_1 = arith.constant 0 : i32
    return %c0_i32, %c0_i32_0 : i32, i32
  }
  func.func @transform_5(%arg0: i32, %arg1: i32) -> (i32, i32) {
    %c0_i32 = arith.constant 0 : i32
    %c0_i32_0 = arith.constant 0 : i32
    %c0_i32_1 = arith.constant 0 : i32
    return %c0_i32, %c0_i32_0 : i32, i32
  }
  func.func @transform_6(%arg0: i32, %arg1: i32) -> (i32, i32) {
    %c0_i32 = arith.constant 0 : i32
    %c0_i32_0 = arith.constant 0 : i32
    %c0_i32_1 = arith.constant 0 : i32
    return %c0_i32, %c0_i32_0 : i32, i32
  }
  func.func @transform_7(%arg0: i32, %arg1: i32) -> (i32, i32) {
    %c0_i32 = arith.constant 0 : i32
    %c0_i32_0 = arith.constant 0 : i32
    %c0_i32_1 = arith.constant 0 : i32
    return %c0_i32, %c0_i32_0 : i32, i32
  }
  func.func @transform_8(%arg0: i32, %arg1: i32) -> (i32, i32) {
    %c0_i32 = arith.constant 0 : i32
    %c0_i32_0 = arith.constant 0 : i32
    %c0_i32_1 = arith.constant 0 : i32
    return %c0_i32, %c0_i32_0 : i32, i32
  }
  func.func @transform_9(%arg0: i32, %arg1: i32) -> (i32, i32, i32) {
    %c0_i32 = arith.constant 0 : i32
    %c0_i32_0 = arith.constant 0 : i32
    return %arg0, %c0_i32, %arg1 : i32, i32, i32
  }
}

</mosaic_0001>

<bundles_post_ra>
// kernel: tpu_custom_call.1
= control target key start
LH: loop header
LB: loop body
LE: loop exit
PB: predicated region body
PF: predicated region fallthrough
CT: control target
= control target key end

     0   :  { %14 = vsyncpa [#allocation3], 0  ;;  %s1162_s0 = inlined_call_operand.hbm [shape: f32[2,16,256], index: 0, kind: input, shape index: {}]   ;;  %s1163_s1 = inlined_call_operand.vmem [shape: f32[16,1], index: 1, kind: input, shape index: {}]   ;;  %s1164_s2 = inlined_call_operand.vmem [shape: f32[16,1], index: 2, kind: input, shape index: {}]   ;;  %s1165_s3 = inlined_call_operand.vmem [shape: bf16[8,16], index: 3, kind: input, shape index: {}]   ;;  %s1166_s4 = inlined_call_operand.vmem [shape: f32[8,1], index: 4, kind: input, shape index: {}]   ;;  %s1167_s5 = inlined_call_operand.vmem [shape: bf16[8,8], index: 5, kind: input, shape index: {}]   ;;  %s1168_s6 = inlined_call_operand.vmem [shape: f32[8,1], index: 6, kind: input, shape index: {}]   ;;  %s1169_s7 = inlined_call_operand.vmem [shape: bf16[32,8], index: 7, kind: input, shape index: {}]   ;;  %s1170_s8 = inlined_call_operand.vmem [shape: f32[32,1], index: 8, kind: input, shape index: {}]   ;;  %s1171_s9 = inlined_call_operand.hbm [shape: bf16[2,32,256], index: 9, kind: output, shape index: {}]  }
   0x1   :  { %16 = vsyncpa [#allocation3 + $0x1], 0 }
   0x2   :  { %17 = vsyncpa [#allocation4], 0 }
   0x3   :  { %19 = vsyncpa [#allocation4 + $0x1], 0  ;;  %s980_s30 = smov 0   ;;  %s982_s10 = smov 0  }
   0x4   :  { %s984_s11 = smov 0   ;;  %s986_s12 = smov 0  }
   0x5   :  { %s988_s13 = smov 0   ;;  %s990_s14 = smov 0  }
   0x6 LB: > { %1175 = sst [smem:[#allocation8_spill]] %s903_s30  ;;  %s706_s15 = sadd.s32 4294967295, %s923_s14   ;;  %s923_s14 = sphi %s990_s14, %s25_s14   ;;  %s919_s13 = sphi %s988_s13, %s1186_s13   ;;  %s915_s12 = sphi %s986_s12, %s1185_s12   ;;  %s911_s11 = sphi %s984_s11, %s1189_s11   ;;  %s907_s10 = sphi %s982_s10, %s1188_s10   ;;  %s903_s30 = sphi %s980_s30, %s1187_s30  }
   0x7   : > { %1176 = sst [smem:[#allocation9_spill]] %s919_s13  ;;  %s707_s16 = sadd.s32 4294967294, %s923_s14  }
   0x8   : > { %s37_s17 = sadd.s32 1, %s919_s13  ;;  %s46_s18 = sadd.s32 1, %s911_s11 }
   0x9   : > { %p39_p0 = scmp.ge.s32.totalorder %s37_s17, 2  ;;  %p53_p1 = scmp.ne.s32.totalorder %s911_s11, %s907_s10 }
   0xa   : > { %p54_p2 = scmp.eq.s32.totalorder %s923_s14, 0  ;;  %p59_p3 = scmp.ne.s32.totalorder %s907_s10, %s903_s30 }
   0xb   : > { %s1191_s17 = smov (%p39_p0, %s37_s17), 0  ;;  %p60_p5 = scmp.eq.s32.totalorder %s706_s15, 0 }
   0xc   : > { %1177 = sst [smem:[#allocation10_spill]] %s1191_s17  ;;  %p1021_p4 = por %p54_p2, %p53_p1 }
   0xd   : > { %s41_s20 = ssub.s32 %s919_s13, %s1191_s17  ;;  %p253_p6 = scmp.eq.s32.totalorder %s706_s15, 1 }
   0xe   : > { %p44_p7 = scmp.eq.s32.totalorder %s41_s20, 0  ;;  %p1027_p8 = por %p60_p5, %p59_p3 }
   0xf   : > { %p1031_p9 = por %p253_p6, %p53_p1  ;;  %p259_p10 = scmp.eq.s32.totalorder %s707_s16, 1 }
  0x10   : > { %s1036_s23 = scalar_select %p44_p7, %s911_s11, %s46_s18  }
  0x11   : > { %p1038_p11 = por %p259_p10, %p59_p3  ;;  %p709_p12 = scmp.ge.s32.totalorder %s923_s14, 2 }
  0x12   : > { %1181 = sst [smem:[#allocation11_spill]] %s1036_s23  ;;  %p753_p13 = scmp.lt.s32.totalorder %s923_s14, 2 }
  0x13   : > { %s303_s25 = sand.u32 1, %s911_s11   ;;  %s737_s27 = sshll.u32 %s919_s13, 5 }
  0x14   : > { %s710_s26 = sshll.u32 %s303_s25, 5  ;;  %s314_s15 = scalar_lea.hbm %s1162_s0, %s737_s27 }
  0x15   : > { %s307_s20 = scalar_lea.vmem [#allocation2], %s710_s26  ;;  %s315_s30 = sshll.u32 %s314_s15, 4  ;;  %s316_s30 = int_to_ptr.hbm [resolvable:$true] %s315_s30 }
  0x16   : > { %s317_s17 = sshll.u32 %s307_s20, 4  ;;  %p746_p0 = pnand %p753_p13, %p1021_p4  ;;  %s318_s17 = int_to_ptr.vmem [resolvable:$true] %s317_s17 }
  0x17   : > { %p713_p1 = scmp.ge.s32.totalorder %s923_s14, 1  ;;  %s304_s16 = scalar_lea.sflag [#allocation3], %s303_s25 }
  0x18   : > { %s925_s18 = smov 256   ;;  %s926_s23 = smov 16  }
  0x19   : > { %748 = dma.hbm_to_vmem [thread:$0]  (!%p746_p0), %s316_s30, 512, %s318_s17, %s304_s16, %s925_s18, %s925_s18, %s926_s23  }
  0x1a   : > { %p325_p2 = scmp.lt.s32.totalorder %s923_s14, 3 }
  0x1c   : > { %p326_p3 = pnand %p713_p1, %p325_p2 }
  0x1d   : > { %s1054_s13 = sand.u32 (!%p326_p3), 1, %s907_s10  }
  0x1e   : > { %329 = sbr.rel (%p326_p3) target bundleno = 615 (0x267), region = 56  ;;  %s714_s26 = sshll.u32 (!%p326_p3), %s1054_s13, 5 }
  0x1f   : > { %s332_s27 = scalar_lea.sflag (!%p326_p3), [#allocation3], %s1054_s13  ;;  %s1060_s19 = scalar_lea.vmem (!%p326_p3), [#allocation2], %s714_s26 }
  0x23   : > { %894 = dma.done.wait (%p1027_p8), %s332_s27, 512  }
  0x24   : > { %896 = vsyncadd (%p1027_p8), %s332_s27, 4294966784  ;;  %v927_v0 = vmov 0   ;;  %v394_v1 = vld [vmem:[%s1164_s2] sm:$0xff]  ;;  %v395_v3 = vld [vmem:[%s1164_s2 + $0x8] sm:$0xff]  ;;  %vm423_vm0 = vcmask 130048   ;;  %vm468_vm1 = vcmask 1043456  }
  0x25   : > { %809 = vset.pattern.permute.xlu1 %v927_v0  ;;  %808 = vset.pattern.permute.xlu0 %v927_v0  ;;  %v378_v2 = vld [vmem:[%s1163_s1] sm:$0xff]  ;;  %v379_v4 = vld [vmem:[%s1163_s1 + $0x8] sm:$0xff]  ;;  %v512_v7 = vld [vmem:[%s1170_s8 + $0x18] sm:$0xff]  ;;  %vm464_vm2 = vcmask 64512   ;;  %s370_s25 = scalar_lea.vmem [#allocation5], %s714_s26  ;;  %s740_s28 = sshll.u32 %s915_s12, 5 }
  0x26   : > { %810 = vset.pattern.permute.xlu2 %v927_v0  ;;  %398 = vperm.xlu1 %809, %v394_v1   ;;  %v510_v5 = vld [vmem:[%s1170_s8 + $0x8] sm:$0xff]  ;;  %v509_v6 = vld [vmem:[%s1170_s8] sm:$0xff]  ;;  %v376_v16 = vld [vmem:[%s1060_s19 + $0x10] sm:$0xff]  ;;  %s615_s26 = scalar_lea.hbm %s1171_s9, %s740_s28  ;;  %s616_s15 = sshll.u32 %s370_s25, 4  ;;  %s617_s15 = int_to_ptr.vmem [resolvable:$true] %s616_s15 }
  0x27   : > { %382 = vperm.xlu0 %808, %v378_v2   ;;  %v417_v8 = vld [vmem:[%s1166_s4] sm:$0xff]  ;;  %v375_v13 = vld [vmem:[%s1060_s19 + $0x8] sm:$0xff]  ;;  %v377_v17 = vld [vmem:[%s1060_s19 + $0x18] sm:$0xff]  ;;  %s602_s20 = scalar_lea.sflag [#allocation4], %s1054_s13  ;;  %s861_s30 = scalar_lea.hbm %s1171_s9, 64 }
  0x28   : > { %420 = vperm.xlu2 %810, %v417_v8   ;;  %v458_v9 = vld [vmem:[%s1168_s6] sm:$0xff]  ;;  %v511_v18 = vld [vmem:[%s1170_s8 + $0x10] sm:$0xff]  ;;  %v739_v62 = vld [vmem:[%s1169_s7 + $0x8] sm:$0xff] }
  0x29   : > { %v374_v12 = vld [vmem:[%s1060_s19] sm:$0xff]  ;;  %s618_s19 = sshll.u32 %s615_s26, 4  ;;  %s619_s19 = int_to_ptr.hbm [resolvable:$true] %s618_s19 }
  0x2a   : > { %v414_v33 = vld [vmem:[%s1165_s3] sm:$0xf]  ;;  %s855_s12 = sshra.s32 %s619_s19, 4  ;;  %s856_s12 = int_to_ptr.hbm [resolvable:$true] %s855_s12 }
  0x2b   : > { %v455_v47 = vld [vmem:[%s1167_s5] sm:$0xf]  ;;  %s857_s16 = scalar_lea.hbm %s856_s12, 32  ;;  %p862_p7 = scmp.lt.s32.totalorder %s856_s12, %s1171_s9 }
  0x2c   : > { %v738_v59 = vld [vmem:[%s1169_s7] sm:$0xff]  ;;  %p858_p4 = scmp.ne.s32.totalorder %s856_s12, %s857_s16  ;;  %p863_p8 = scmp.lt.s32.totalorder %s861_s30, %s857_s16 }
  0x2e   : > { %403 = vperm.xlu1 %809, %v395_v3   ;;  %p859_p5 = pnand %p858_p4, %p1031_p9  ;;  %p864_p10 = por %p863_p8, %p862_p7 }
  0x2f   : > { %387 = vperm.xlu0 %808, %v379_v4  }
  0x30   : > { %461 = vperm.xlu2 %810, %v458_v9   ;;  %p860_p6 = pneg %p859_p5 }
  0x32   : > { %p865_p13 = pnand %p864_p10, %p860_p6 }
  0x36   : > { %520 = vperm.xlu1 %809, %v510_v5  }
  0x37   : > { %515 = vperm.xlu0 %808, %v509_v6  }
  0x38   : > { %525 = vperm.xlu2 %810, %v511_v18  }
  0x3f   : > { %530 = vperm.xlu0 %808, %v512_v7  }
  0x82   : > { %v421_v34 = vpop.permute.xlu2 %420 }
  0x8a   : > { %v462_v48 = vpop.permute.xlu2 %461 }
  0x98   : > { %v399_v10 = vpop.permute.xlu1 %398 }
  0x99   : > { %v383_v11 = vpop.permute.xlu0 %382 }
  0x9a   : > { %v390_v14 = vmul.f32 %v383_v11, %v374_v12  ;;  %v391_v15 = vmul.f32 %v383_v11, %v375_v13  ;;  %v526_v11 = vpop.permute.xlu2 %525 }
  0x9c   : > { %v406_v22 = vadd.f32 %v399_v10, %v390_v14  ;;  %v407_v23 = vadd.f32 %v399_v10, %v391_v15 }
  0x9e   : > { %v410_v27 = vmax.f32 %v406_v22, 0.0  ;;  %v411_v29 = vmax.f32 %v407_v23, 0.0 }
  0xa0   : > { %v404_v24 = vpop.permute.xlu1 %403 }
  0xa1   : > { %v388_v19 = vpop.permute.xlu0 %387 }
  0xa2   : > { %v392_v20 = vmul.f32 %v388_v19, %v376_v16  ;;  %v393_v21 = vmul.f32 %v388_v19, %v377_v17 }
  0xa4   : > { %v408_v25 = vadd.f32 %v404_v24, %v392_v20  ;;  %v409_v26 = vadd.f32 %v404_v24, %v393_v21 }
  0xa6   : > { %v412_v28 = vmax.f32 %v408_v25, 0.0  ;;  %v413_v30 = vmax.f32 %v409_v26, 0.0 }
  0xa8   : > { %v415_v31 = vpack.c.bf16 %v412_v28, %v410_v27  ;;  %v416_v32 = vpack.c.bf16 %v413_v30, %v411_v29  ;;  %v521_v5 = vpop.permute.xlu1 %520 }
  0xa9   : > { %v516_v63 = vpop.permute.xlu0 %515 }
  0xaa   : > { %434 = vmatpush.bf16.msra.mxu2 %v415_v31  ;;  %447 = vmatpush.bf16.msra.mxu3 %v416_v32 }
  0xad   : > { %716 = vmatmul.msk.bf16.vlgmr.msra.gmra.mxu2 %vm423_vm0, %v414_v33  ;;  %717 = vmatmul.msk.bf16.vlgmr.msra.gmra.mxu3 %vm423_vm0, %v414_v33 }
  0xb1   : > { %v531_v17 = vpop.permute.xlu0 %530 }
 0x130   : > { %v436_v35 = vpop.f32.mrf.mxu2  ;;  %v449_v36 = vpop.f32.mrf.mxu3 }
 0x131   : > { %v437_v37 = vadd.f32 %v436_v35, %v421_v34  ;;  %v450_v38 = vadd.f32 %v449_v36, %v421_v34 }
 0x133   : > { %v453_v39 = vmax.f32 %v437_v37, 0.0  ;;  %v454_v40 = vmax.f32 %v450_v38, 0.0 }
 0x135   : > { %v456_v41 = vpack.c.bf16 %v453_v39, %v453_v39  ;;  %v457_v42 = vpack.c.bf16 %v454_v40, %v454_v40 }
 0x137   : > { %v470_v43 = vsel %vm468_vm1, %v456_v41, 0  ;;  %v473_v44 = vsel %vm468_vm1, %v457_v42, 0 }
 0x138   : > { %v438_v45 = vpop.f32.mrf.mxu2  ;;  %v451_v46 = vpop.f32.mrf.mxu3  ;;  %482 = vmatpush.bf16.msrb.mxu2 %v470_v43  ;;  %495 = vmatpush.bf16.msrb.mxu3 %v473_v44 }
 0x13b   : > { %718 = vmatmul.msk.bf16.vlgmr.msrb.gmra.mxu2 %vm464_vm2, %v455_v47  ;;  %719 = vmatmul.msk.bf16.vlgmr.msrb.gmra.mxu3 %vm464_vm2, %v455_v47 }
 0x1be   : > { %v484_v49 = vpop.f32.mrf.mxu2  ;;  %v497_v50 = vpop.f32.mrf.mxu3 }
 0x1bf   : > { %v485_v51 = vadd.f32 %v484_v49, %v462_v48  ;;  %v498_v52 = vadd.f32 %v497_v50, %v462_v48 }
 0x1c1   : > { %v501_v53 = vmax.f32 %v485_v51, 0.0  ;;  %v502_v54 = vmax.f32 %v498_v52, 0.0 }
 0x1c3   : > { %v507_v55 = vpack.c.bf16 %v501_v53, %v501_v53  ;;  %v508_v56 = vpack.c.bf16 %v502_v54, %v502_v54 }
 0x1c5   : > { %v550_v57 = vsel %vm468_vm1, %v507_v55, 0  ;;  %v553_v58 = vsel %vm468_vm1, %v508_v56, 0 }
 0x1c6   : > { %562 = vmatpush.bf16.msra.mxu0 %v550_v57  ;;  %581 = vmatpush.bf16.msra.mxu1 %v553_v58  ;;  %v486_v60 = vpop.f32.mrf.mxu2  ;;  %v499_v61 = vpop.f32.mrf.mxu3 }
 0x1c9   : > { %728 = vmatmul.msk.bf16.vlgmr.msra.gmra.mxu0 %vm464_vm2, %v738_v59  ;;  %730 = vmatmul.msk.bf16.vlgmr.msra.gmra.mxu1 %vm464_vm2, %v738_v59 }
 0x1d9   : > { %729 = vmatmul.msk.bf16.gmra.mxu0 %vm464_vm2, %v739_v62  ;;  %731 = vmatmul.msk.bf16.gmra.mxu1 %vm464_vm2, %v739_v62 }
 0x246   : > { %v564_v0 = vpop.f32.mrf.mxu0  ;;  %v583_v1 = vpop.f32.mrf.mxu1 }
 0x247   : > { %v565_v2 = vadd.f32 %v564_v0, %v516_v63  ;;  %v584_v3 = vadd.f32 %v583_v1, %v516_v63 }
 0x249   : > { %v593_v4 = vpack.c.bf16 %v584_v3, %v565_v2 }
 0x24b   : > { %597 = vst [vmem:[%s370_s25] sm:$0xff] %v593_v4 }
 0x24e   : > { %v566_v6 = vpop.f32.mrf.mxu0  ;;  %v585_v7 = vpop.f32.mrf.mxu1 }
 0x24f   : > { %v567_v8 = vadd.f32 %v566_v6, %v521_v5  ;;  %v586_v9 = vadd.f32 %v585_v7, %v521_v5 }
 0x251   : > { %v594_v10 = vpack.c.bf16 %v586_v9, %v567_v8 }
 0x253   : > { %598 = vst [vmem:[%s370_s25 + $0x8] sm:$0xff] %v594_v10 }
 0x256   : > { %v569_v12 = vpop.f32.mrf.mxu0  ;;  %v588_v13 = vpop.f32.mrf.mxu1 }
 0x257   : > { %v570_v14 = vadd.f32 %v569_v12, %v526_v11  ;;  %v589_v15 = vadd.f32 %v588_v13, %v526_v11 }
 0x259   : > { %v595_v16 = vpack.c.bf16 %v589_v15, %v570_v14 }
 0x25b   : > { %599 = vst [vmem:[%s370_s25 + $0x10] sm:$0xff] %v595_v16 }
 0x25e   : > { %v571_v18 = vpop.f32.mrf.mxu0  ;;  %v590_v19 = vpop.f32.mrf.mxu1 }
 0x25f   : > { %v572_v20 = vadd.f32 %v571_v18, %v531_v17  ;;  %v591_v21 = vadd.f32 %v590_v19, %v531_v17 }
 0x261   : > { %v596_v22 = vpack.c.bf16 %v591_v21, %v572_v20 }
 0x263   : > { %600 = vst [vmem:[%s370_s25 + $0x18] sm:$0xff] %v596_v22 }
 0x264   : > { %868 = shalt.err (!%p865_p13)
}
 0x265   : > { %s928_s13 = smov 128   ;;  %s929_s25 = smov 8  }
 0x266   : > { %743 = dma.vmem_to_hbm [thread:$0]  (%p1031_p9), %s617_s15, 512, %s619_s19, %s602_s20, %s928_s13, %s928_s13, %s929_s25  }
 0x267 PF: > { %s1183_s28 = sld [smem:[#allocation8_spill]]  ;;  %p750_p0 = pnand %p709_p12, %p1038_p11 }
 0x269   : > { %p751_p1 = pneg %p750_p0 }
 0x26d   : > { %s633_s29 = sand.u32 1, %s1183_s28  }
 0x26e   : > { %s634_s21 = scalar_lea.sflag [#allocation4], %s633_s29 }
 0x26f   : > { %898 = dma.done.wait (%p751_p1), %s634_s21, 512  }
 0x270   : > { %900 = vsyncadd (%p751_p1), %s634_s21, 4294966784  ;;  %s25_s14 = sadd.s32 1, %s923_s14   ;;  %s1184_s26 = sld [smem:[#allocation11_spill]] }
 0x271   : > { %p22_p2 = scmp.ge.s32.totalorder %s25_s14, 4   ;;  %s1185_s12 = sld [smem:[#allocation9_spill]] }
 0x272   : > { %s1186_s13 = sld [smem:[#allocation10_spill]]  ;;  %s1187_s30 = smov %s907_s10 }
 0x273   : > { %s1188_s10 = smov %s911_s11  ;;  %24 = sbr.rel (!%p22_p2) target bundleno = 6 (0x6), region = 101 }
 0x276   : > { %s1189_s11 = smov %s1184_s26 }
 0x278   :  { %640 = vsyncpa [#allocation3], 1 }
 0x279   :  { %642 = vsyncpa [#allocation3 + $0x1], 1 }
 0x27a   :  { %643 = vsyncpa [#allocation4], 1 }
 0x27b   :  { %645 = vsyncpa [#allocation4 + $0x1], 1 }

</bundles_post_ra>
